<compile_context>
chip_gen: v7x
topology: tpu7x:2x2x1
jax: 0.10.0
libtpu: 0.0.40
codegen_flags: <defaults>
</compile_context>

<pallas_src>
import jax
import jax.numpy as jnp
from jax.experimental import pallas as pl
from jax.experimental.pallas import tpu as pltpu

LANES = 128


def _wce_kernel(x_ref, y_ref, w_ref, out_ref, acc_ref):
    # x_ref  : (3, TR, 128) logits, class-major (lane-dense rows)
    # y_ref  : (TR, 128)    int32 labels
    # w_ref  : (TR, 128)    f32 selected per-row weight (0 for padding rows)
    # out_ref: (1, TR, 128) per-chunk partial sums (written on last tile of chunk)
    # acc_ref: (TR, 128)    f32 accumulator scratch
    t = pl.program_id(1)

    @pl.when(t == 0)
    def _init():
        acc_ref[...] = jnp.zeros_like(acc_ref)

    x0 = x_ref[0].astype(jnp.float32)
    x1 = x_ref[1].astype(jnp.float32)
    x2 = x_ref[2].astype(jnp.float32)
    y = y_ref[...]
    w = w_ref[...]

    # Elementwise log-sum-exp over the 3 class slabs (numerically stable).
    m = jnp.maximum(jnp.maximum(x0, x1), x2)
    lse = m + jnp.log(jnp.exp(x0 - m) + jnp.exp(x1 - m) + jnp.exp(x2 - m))

    # Logit of the true class via 2 selects (replaces iota/one-hot/cross-lane sum).
    x_y = jnp.where(y == 0, x0, jnp.where(y == 1, x1, x2))

    # -w * log_softmax(x)[y]  ==  w * (lse - x_y);  padded rows have w == 0.
    acc_ref[...] += w * (lse - x_y)

    @pl.when(t == pl.num_programs(1) - 1)
    def _finalize():
        out_ref[0] = acc_ref[...]


def weighted_cross_entropy(output, y, w, *, tile_rows=256):
    """Pallas forward pass of WeightedCrossEntropy. output flattens to (N, 3),
    y flattens to (N,), w has shape (14, 3), N % 14 == 0."""
    logits = output.reshape(-1, 3)
    if logits.dtype not in (jnp.float32, jnp.bfloat16):
        logits = logits.astype(jnp.float32)
    n = logits.shape[0]
    assert n % 14 == 0, "flattened length must be a multiple of 14 (matches torch repeat)"
    assert w.shape == (14, 3)

    y_flat = y.reshape(-1).astype(jnp.int32)
    # Per-row weight gather (replaces jnp.tile'd (N,3) weights + one-hot multiply).
    w_sel = w.astype(jnp.float32)[jnp.arange(n, dtype=jnp.int32) % 14, y_flat]

    # ---- lane-dense, class-major layout + padding --------------------------
    rows = pl.cdiv(n, LANES)
    tr = max(8, (int(tile_rows) // 8) * 8)          # sublane rows per tile
    tr = min(tr, ((rows + 7) // 8) * 8)             # don't over-allocate for tiny N
    total_tiles = pl.cdiv(rows, tr)
    num_chunks = 2 if total_tiles >= 2 else 1       # both TensorCores on v7x
    tiles_per_chunk = pl.cdiv(total_tiles, num_chunks)
    rows_pad = num_chunks * tiles_per_chunk * tr
    n_pad = rows_pad * LANES
    pad = n_pad - n

    xt = jnp.pad(logits.T, ((0, 0), (0, pad))).reshape(3, rows_pad, LANES)
    y2 = jnp.pad(y_flat, (0, pad)).reshape(rows_pad, LANES)
    w2 = jnp.pad(w_sel, (0, pad)).reshape(rows_pad, LANES)   # zero weight => zero contrib

    x_bytes = jnp.dtype(logits.dtype).itemsize
    cost = pl.CostEstimate(
        flops=12 * n_pad,
        transcendentals=4 * n_pad,
        bytes_accessed=(3 * x_bytes + 4 + 4) * n_pad + num_chunks * tr * LANES * 4,
    )

    partials = pl.pallas_call(
        _wce_kernel,
        grid=(num_chunks, tiles_per_chunk),
        in_specs=[
            pl.BlockSpec((3, tr, LANES), lambda c, t: (0, c * tiles_per_chunk + t, 0)),
            pl.BlockSpec((tr, LANES), lambda c, t: (c * tiles_per_chunk + t, 0)),
            pl.BlockSpec((tr, LANES), lambda c, t: (c * tiles_per_chunk + t, 0)),
        ],
        out_specs=pl.BlockSpec((1, tr, LANES), lambda c, t: (c, 0, 0)),
        out_shape=jax.ShapeDtypeStruct((num_chunks, tr, LANES), jnp.float32),
        scratch_shapes=[pltpu.VMEM((tr, LANES), jnp.float32)],
        compiler_params=pltpu.CompilerParams(
            dimension_semantics=("parallel", "arbitrary")),
        cost_estimate=cost,
    )(xt, y2, w2)

    # Final tiny reduction + mean over the N*3 elements of the torch product tensor.
    return jnp.sum(partials) / (3.0 * n)


def _reference(output, y, w):
    logits = output.reshape(-1, 3).astype(jnp.float32)
    n = logits.shape[0]
    log_sm = jax.nn.log_softmax(logits, axis=1)
    onehot = jax.nn.one_hot(y.reshape(-1), 3, dtype=jnp.float32)
    weights = jnp.tile(w.astype(jnp.float32), (n // 14, 1))
    return -jnp.mean(log_sm * onehot * weights)


def weighted_cross_entropy_auto(output, y, w, *, small_n_threshold=4096):
    """Dispatch: for tiny N the per-pallas_call overhead dwarfs the math."""
    n = output.size // 3
    if n < small_n_threshold:
        return _reference(output, y, w)
    return weighted_cross_entropy(output, y, w)


if __name__ == "__main__":
    key = jax.random.PRNGKey(0)
    k1, k2, k3, k4 = jax.random.split(key, 4)

    # Deterministic (14, 3) weight parameter.
    w = (jnp.arange(14 * 3, dtype=jnp.float32).reshape(14, 3) % 5 + 1.0) / 5.0

    # Case 1: tiny batch (single tile, single chunk).
    B1, S, C = 2, 14, 3
    out1 = jax.random.normal(k1, (B1, S, C), dtype=jnp.float32)
    y1 = jax.random.randint(k2, (B1, S), 0, C, dtype=jnp.int32)
    loss1 = weighted_cross_entropy(out1, y1, w)
    jax.block_until_ready(loss1)
    ref1 = _reference(out1, y1, w)
    assert jnp.isfinite(loss1)
    assert abs(float(loss1) - float(ref1)) < 1e-4 * max(1.0, abs(float(ref1)))

    # Case 2: enough rows to exercise multi-tile accumulation + both grid chunks.
    B2 = 512
    out2 = jax.random.normal(k3, (B2, S, C), dtype=jnp.float32)
    y2 = jax.random.randint(k4, (B2, S), 0, C, dtype=jnp.int32)
    loss2 = weighted_cross_entropy(out2, y2, w, tile_rows=16)
    jax.block_until_ready(loss2)
    ref2 = _reference(out2, y2, w)
    assert jnp.isfinite(loss2)
    assert abs(float(loss2) - float(ref2)) < 1e-4 * max(1.0, abs(float(ref2)))

    print("KERNEL_OK")
</pallas_src>

<mosaic_0001>
module attributes {stable_mosaic.version = 11 : i64} {
  func.func @_wce_kernel(%arg0: i32, %arg1: i32, %arg2: memref<3x8x128xf32, #tpu.memory_space<vmem>>, %arg3: memref<8x128xi32, #tpu.memory_space<vmem>>, %arg4: memref<8x128xf32, #tpu.memory_space<vmem>>, %arg5: memref<1x8x128xf32, #tpu.memory_space<vmem>>, %arg6: memref<8x128xf32, #tpu.memory_space<vmem>>) attributes {dimension_semantics = [#tpu.dimension_semantics<parallel>, #tpu.dimension_semantics<arbitrary>], iteration_bounds = array<i64: 1, 1>, scalar_prefetch = 0 : i64, scratch_operands = 1 : i64, tpu.core_type = #tpu.core_type<tc>, window_params = [{transform_indices = @transform_0, window_bounds = array<i64: 3, 8, 128>}, {transform_indices = @transform_1, window_bounds = array<i64: 8, 128>}, {transform_indices = @transform_2, window_bounds = array<i64: 8, 128>}, {transform_indices = @transform_3, window_bounds = array<i64: 1, 8, 128>}]} {
    %c0_i32 = arith.constant 0 : i32
    %0 = arith.cmpi eq, %arg1, %c0_i32 : i32
    %1 = arith.extui %0 : i1 to i32
    %c0_i32_0 = arith.constant 0 : i32
    %2 = arith.cmpi ne, %1, %c0_i32_0 : i32
    scf.if %2 {
      %cst = arith.constant 0.000000e+00 : f32
      %37 = vector.broadcast %cst : f32 to vector<8x128xf32>
      %c0_18 = arith.constant 0 : index
      %c0_19 = arith.constant 0 : index
      %38 = vector.load %arg6[%c0_18, %c0_19] : memref<8x128xf32, #tpu.memory_space<vmem>>, vector<8x128xf32>
      tpu.vector_store %arg6[%c0_18, %c0_19], %37 {strides = array<i32>} : memref<8x128xf32, #tpu.memory_space<vmem>>, vector<8x128xf32>,
    } else {
    }
    %c0 = arith.constant 0 : index
    %c0_1 = arith.constant 0 : index
    %c0_2 = arith.constant 0 : index
    %3 = vector.load %arg2[%c0, %c0_1, %c0_2] : memref<3x8x128xf32, #tpu.memory_space<vmem>>, vector<1x8x128xf32>
    %4 = vector.shape_cast %3 : vector<1x8x128xf32> to vector<8x128xf32>
    %c1 = arith.constant 1 : index
    %c0_3 = arith.constant 0 : index
    %c0_4 = arith.constant 0 : index
    %5 = vector.load %arg2[%c1, %c0_3, %c0_4] : memref<3x8x128xf32, #tpu.memory_space<vmem>>, vector<1x8x128xf32>
    %6 = vector.shape_cast %5 : vector<1x8x128xf32> to vector<8x128xf32>
    %c2 = arith.constant 2 : index
    %c0_5 = arith.constant 0 : index
    %c0_6 = arith.constant 0 : index
    %7 = vector.load %arg2[%c2, %c0_5, %c0_6] : memref<3x8x128xf32, #tpu.memory_space<vmem>>, vector<1x8x128xf32>
    %8 = vector.shape_cast %7 : vector<1x8x128xf32> to vector<8x128xf32>
    %c0_7 = arith.constant 0 : index
    %c0_8 = arith.constant 0 : index
    %9 = vector.load %arg3[%c0_7, %c0_8] : memref<8x128xi32, #tpu.memory_space<vmem>>, vector<8x128xi32>
    %c0_9 = arith.constant 0 : index
    %c0_10 = arith.constant 0 : index
    %10 = vector.load %arg4[%c0_9, %c0_10] : memref<8x128xf32, #tpu.memory_space<vmem>>, vector<8x128xf32>
    %11 = arith.maximumf %4, %6 : vector<8x128xf32>
    %12 = arith.maximumf %11, %8 : vector<8x128xf32>
    %13 = arith.subf %4, %12 : vector<8x128xf32>
    %14 = math.exp %13 : vector<8x128xf32>
    %15 = arith.subf %6, %12 : vector<8x128xf32>
    %16 = math.exp %15 : vector<8x128xf32>
    %17 = arith.addf %14, %16 : vector<8x128xf32>
    %18 = arith.subf %8, %12 : vector<8x128xf32>
    %19 = math.exp %18 : vector<8x128xf32>
    %20 = arith.addf %17, %19 : vector<8x128xf32>
    %21 = math.log %20 : vector<8x128xf32>
    %22 = arith.addf %12, %21 : vector<8x128xf32>
    %c0_i32_11 = arith.constant 0 : i32
    %23 = vector.broadcast %c0_i32_11 : i32 to vector<8x128xi32>
    %24 = arith.cmpi eq, %9, %23 : vector<8x128xi32>
    %c1_i32 = arith.constant 1 : i32
    %25 = vector.broadcast %c1_i32 : i32 to vector<8x128xi32>
    %26 = arith.cmpi eq, %9, %25 : vector<8x128xi32>
    %27 = arith.select %26, %6, %8 : vector<8x128xi1>, vector<8x128xf32>
    %28 = arith.select %24, %4, %27 : vector<8x128xi1>, vector<8x128xf32>
    %c0_12 = arith.constant 0 : index
    %c0_13 = arith.constant 0 : index
    %29 = vector.load %arg6[%c0_12, %c0_13] : memref<8x128xf32, #tpu.memory_space<vmem>>, vector<8x128xf32>
    %30 = arith.subf %22, %28 : vector<8x128xf32>
    %31 = arith.mulf %10, %30 : vector<8x128xf32>
    %32 = arith.addf %29, %31 : vector<8x128xf32>
    %c0_14 = arith.constant 0 : index
    %c0_15 = arith.constant 0 : index
    %33 = vector.load %arg6[%c0_14, %c0_15] : memref<8x128xf32, #tpu.memory_space<vmem>>, vector<8x128xf32>
    tpu.vector_store %arg6[%c0_14, %c0_15], %32 {strides = array<i32>} : memref<8x128xf32, #tpu.memory_space<vmem>>, vector<8x128xf32>,
    %c0_i32_16 = arith.constant 0 : i32
    %34 = arith.cmpi eq, %arg1, %c0_i32_16 : i32
    %35 = arith.extui %34 : i1 to i32
    %c0_i32_17 = arith.constant 0 : i32
    %36 = arith.cmpi ne, %35, %c0_i32_17 : i32
    scf.if %36 {
      %c0_18 = arith.constant 0 : index
      %c0_19 = arith.constant 0 : index
      %37 = vector.load %arg6[%c0_18, %c0_19] : memref<8x128xf32, #tpu.memory_space<vmem>>, vector<8x128xf32>
      %c0_20 = arith.constant 0 : index
      %c0_21 = arith.constant 0 : index
      %c0_22 = arith.constant 0 : index
      %38 = vector.load %arg5[%c0_20, %c0_21, %c0_22] : memref<1x8x128xf32, #tpu.memory_space<vmem>>, vector<1x8x128xf32>
      %39 = vector.shape_cast %38 : vector<1x8x128xf32> to vector<8x128xf32>
      %40 = vector.shape_cast %37 : vector<8x128xf32> to vector<1x8x128xf32>
      tpu.vector_store %arg5[%c0_20, %c0_21, %c0_22], %40 {strides = array<i32>} : memref<1x8x128xf32, #tpu.memory_space<vmem>>, vector<1x8x128xf32>,
    } else {
    }
    return
  }
  func.func @transform_0(%arg0: i32, %arg1: i32) -> (i32, i32, i32) {
    %c1_i32 = arith.constant 1 : i32
    %0 = arith.muli %arg0, %c1_i32 : i32
    %1 = arith.addi %0, %arg1 : i32
    %c0_i32 = arith.constant 0 : i32
    %c0_i32_0 = arith.constant 0 : i32
    %c0_i32_1 = arith.constant 0 : i32
    return %c0_i32, %1, %c0_i32_0 : i32, i32, i32
  }
  func.func @transform_1(%arg0: i32, %arg1: i32) -> (i32, i32) {
    %c1_i32 = arith.constant 1 : i32
    %0 = arith.muli %arg0, %c1_i32 : i32
    %1 = arith.addi %0, %arg1 : i32
    %c0_i32 = arith.constant 0 : i32
    %c0_i32_0 = arith.constant 0 : i32
    return %1, %c0_i32 : i32, i32
  }
  func.func @transform_2(%arg0: i32, %arg1: i32) -> (i32, i32) {
    %c1_i32 = arith.constant 1 : i32
    %0 = arith.muli %arg0, %c1_i32 : i32
    %1 = arith.addi %0, %arg1 : i32
    %c0_i32 = arith.constant 0 : i32
    %c0_i32_0 = arith.constant 0 : i32
    return %1, %c0_i32 : i32, i32
  }
  func.func @transform_3(%arg0: i32, %arg1: i32) -> (i32, i32, i32) {
    %c0_i32 = arith.constant 0 : i32
    %c0_i32_0 = arith.constant 0 : i32
    %c0_i32_1 = arith.constant 0 : i32
    return %arg0, %c0_i32, %c0_i32_0 : i32, i32, i32
  }
}

</mosaic_0001>

<bundles_post_ra>
// kernel: tpu_custom_call.1
= control target key start
LH: loop header
LB: loop body
LE: loop exit
PB: predicated region body
PF: predicated region fallthrough
CT: control target
= control target key end

     0   :  { %8 = vsyncpa [#allocation4], 0  ;;  %s311_s0 = inlined_call_operand.hbm [shape: f32[3,8,128], index: 0, kind: input, shape index: {}]   ;;  %s312_s1 = inlined_call_operand.hbm [shape: s32[8,128], index: 1, kind: input, shape index: {}]   ;;  %s313_s2 = inlined_call_operand.hbm [shape: f32[8,128], index: 2, kind: input, shape index: {}]   ;;  %s314_s3 = inlined_call_operand.hbm [shape: f32[1,8,128], index: 3, kind: output, shape index: {}]  }
   0x1   :  { %9 = vsyncpa [#allocation7], 0 }
   0x2   :  { %10 = vsyncpa [#allocation5], 0  ;;  %s230_s12 = smov [#allocation6]   ;;  %s231_s14 = smov [#allocation3]  }
   0x3   :  { %s35_s13 = sshll.u32 %s230_s12, 4  ;;  %s19_s15 = sshll.u32 %s231_s14, 4  ;;  %s36_s13 = int_to_ptr.vmem [resolvable:$true] %s35_s13  ;;  %s256_s15 = int_to_ptr.vmem [resolvable:$true] %s19_s15 }
   0x4   :  { %s136_s18 = scalar_lea.hbm %s312_s1, 128 }
   0x5   :  { %p137_p0 = scmp.ne.s32.totalorder %s312_s1, %s136_s18  ;;  %p140_p1 = scmp.lt.u32.totalorder %s136_s18, %s312_s1 }
   0x7   :  { %p142_p2 = pnand %p140_p1, %p137_p0 }
   0x9   :  { %145 = shalt.err (!%p142_p2)
}
   0xa   :  { %s146_s23 = scalar_lea.vmem %s36_s13, 128  ;;  %p151_p4 = scmp.lt.s32.totalorder %s36_s13, %s36_s13 }
   0xb   :  { %p147_p3 = scmp.ne.s32.totalorder %s36_s13, %s146_s23  ;;  %p152_p5 = scmp.lt.s32.totalorder %s146_s23, %s146_s23 }
   0xd   :  { %p153_p6 = por %p152_p5, %p151_p4 }
   0xf   :  { %p154_p7 = pnand %p153_p6, %p147_p3 }
  0x11   :  { %157 = shalt.err (!%p154_p7)
}
  0x12   :  { %38 = dma.hbm_to_vmem [thread:$0]  %s312_s1, 128, %s36_s13, [#allocation7]  }
  0x13   :  { %s158_s28 = scalar_lea.hbm %s311_s0, 384 }
  0x14   :  { %p159_p8 = scmp.ne.s32.totalorder %s311_s0, %s158_s28  ;;  %p162_p9 = scmp.lt.u32.totalorder %s158_s28, %s311_s0 }
  0x16   :  { %p164_p10 = pnand %p162_p9, %p159_p8 }
  0x18   :  { %167 = shalt.err (!%p164_p10)
}
  0x19   :  { %s168_s6 = scalar_lea.vmem %s256_s15, 384  ;;  %p173_p12 = scmp.lt.s32.totalorder %s256_s15, %s256_s15 }
  0x1a   :  { %p169_p11 = scmp.ne.s32.totalorder %s256_s15, %s168_s6  ;;  %p174_p13 = scmp.lt.s32.totalorder %s168_s6, %s168_s6 }
  0x1c   :  { %p175_p0 = por %p174_p13, %p173_p12 }
  0x1e   :  { %p176_p1 = pnand %p175_p0, %p169_p11 }
  0x20   :  { %179 = shalt.err (!%p176_p1)
}
  0x21   :  { %s232_s1 = smov 128   ;;  %s233_s7 = smov 8  }
  0x22   :  { %25 = dma.hbm_to_vmem [thread:$0]  %s311_s0, 384, %s256_s15, [#allocation4], %s232_s1, %s232_s1, %s233_s7  }
  0x23   :  { %s234_s10 = smov [#allocation8]   ;;  %s180_s14 = scalar_lea.hbm %s313_s2, 128 }
  0x24   :  { %s48_s11 = sshll.u32 %s234_s10, 4  ;;  %p181_p2 = scmp.ne.s32.totalorder %s313_s2, %s180_s14  ;;  %s49_s11 = int_to_ptr.vmem [resolvable:$true] %s48_s11 }
  0x25   :  { %p184_p3 = scmp.lt.u32.totalorder %s180_s14, %s313_s2 }
  0x27   :  { %p186_p4 = pnand %p184_p3, %p181_p2 }
  0x29   :  { %189 = shalt.err (!%p186_p4)
}
  0x2a   :  { %s190_s20 = scalar_lea.vmem %s49_s11, 128  ;;  %p195_p6 = scmp.lt.s32.totalorder %s49_s11, %s49_s11 }
  0x2b   :  { %p191_p5 = scmp.ne.s32.totalorder %s49_s11, %s190_s20  ;;  %p196_p7 = scmp.lt.s32.totalorder %s190_s20, %s190_s20 }
  0x2d   :  { %p197_p8 = por %p196_p7, %p195_p6 }
  0x2f   :  { %p198_p9 = pnand %p197_p8, %p191_p5 }
  0x31   :  { %201 = shalt.err (!%p198_p9)
}
  0x32   :  { %51 = dma.hbm_to_vmem [thread:$0]  %s313_s2, 128, %s49_s11, [#allocation7]  }
  0x33   :  { %224 = dma.done.wait [#allocation4], 384  }
  0x34   :  { %225 = vsyncadd [#allocation4], 4294966912 }
  0x35   :  { %226 = dma.done.wait [#allocation7], 256  }
  0x36   :  { %227 = vsyncadd [#allocation7], 4294967040  ;;  %v69_v0 = vld [vmem:[#allocation3] sm:$0xff]  ;;  %v71_v1 = vld [vmem:[#allocation3 + $0x8] sm:$0xff]  ;;  %s235_s2 = smov [#allocation9]  }
  0x37   :  { %v73_v2 = vld [vmem:[#allocation3 + $0x10] sm:$0xff]  ;;  %v76_v3 = vmax.f32 %v69_v0, %v71_v1  ;;  %v74_v16 = vld [vmem:[#allocation6] sm:$0xff]  ;;  %v75_v22 = vld [vmem:[#allocation8] sm:$0xff]  ;;  %s112_s21 = sshll.u32 %s235_s2, 4  ;;  %s113_s21 = int_to_ptr.vmem [resolvable:$true] %s112_s21 }
  0x38   :  { %vm93_vm0 = vcmp.eq.s32.totalorder %v74_v16, 1  ;;  %vm92_vm1 = vcmp.eq.s32.totalorder %v74_v16, 0  ;;  %s202_s22 = scalar_lea.vmem %s113_s21, 128  ;;  %p207_p11 = scmp.lt.s32.totalorder %s113_s21, %s113_s21 }
  0x39   :  { %v77_v4 = vmax.f32 %v76_v3, %v73_v2  ;;  %v94_v17 = vsel %vm93_vm0, %v71_v1, %v73_v2  ;;  %p203_p10 = scmp.ne.s32.totalorder %s113_s21, %s202_s22  ;;  %p208_p12 = scmp.lt.s32.totalorder %s202_s22, %s202_s22 }
  0x3a   :  { %v95_v20 = vsel %vm92_vm1, %v69_v0, %v94_v17 }
  0x3b   :  { %v78_v5 = vsub.f32 %v69_v0, %v77_v4  ;;  %v81_v6 = vsub.f32 %v71_v1, %v77_v4  ;;  %v85_v7 = vsub.f32 %v73_v2, %v77_v4  ;;  %p209_p13 = por %p208_p12, %p207_p11 }
  0x3d   :  { %v79_v8 = vmul.f32 1.442695, %v78_v5  ;;  %v82_v9 = vmul.f32 1.442695, %v81_v6  ;;  %v86_v10 = vmul.f32 1.442695, %v85_v7  ;;  %p210_p0 = pnand %p209_p13, %p203_p10 }
  0x3f   :  { %128 = vpow2.f32 %v79_v8 }
  0x40   :  { %130 = vpow2.f32 %v82_v9 }
  0x41   :  { %132 = vpow2.f32 %v86_v10 }
  0x49   :  { %v129_v11 = vpop.eup %128 }
  0x4a   :  { %v131_v12 = vpop.eup %130 }
  0x4b   :  { %v133_v13 = vpop.eup %132  ;;  %v84_v14 = vadd.f32 %v131_v12, %v129_v11 }
  0x4d   :  { %v88_v15 = vadd.f32 %v133_v13, %v84_v14 }
  0x4f   :  { %134 = vlog2.f32 %v88_v15 }
  0x59   :  { %v135_v18 = vpop.eup %134 }
  0x5a   :  { %v90_v19 = vmul.f32 0.6931472, %v135_v18 }
  0x5c   :  { %v91_v21 = vadd.f32 %v90_v19, %v77_v4 }
  0x5e   :  { %v97_v23 = vsub.f32 %v91_v21, %v95_v20 }
  0x60   :  { %v98_v24 = vmul.f32 %v97_v23, %v75_v22 }
  0x62   :  { %105 = vst [vmem:[#allocation9] sm:$0xff] %v98_v24 }
  0x63   :  { %213 = shalt.err (!%p210_p0)
}
  0x64   :  { %s214_s25 = scalar_lea.hbm %s314_s3, 128 }
  0x65   :  { %p215_p1 = scmp.ne.s32.totalorder %s314_s3, %s214_s25  ;;  %p218_p2 = scmp.lt.u32.totalorder %s214_s25, %s314_s3 }
  0x67   :  { %p220_p3 = pnand %p218_p2, %p215_p1 }
  0x69   :  { %223 = shalt.err (!%p220_p3)
}
  0x6a   :  { %115 = dma.vmem_to_hbm [thread:$0]  %s113_s21, 128, %s314_s3, [#allocation5]  }
  0x6b   :  { %228 = dma.done.wait [#allocation5], 128  }
  0x6c   :  { %229 = vsyncadd [#allocation5], 4294967168 }
  0x6d   :  { %119 = vsyncpa [#allocation4], 1 }
  0x6e   :  { %120 = vsyncpa [#allocation7], 1 }
  0x6f   :  { %121 = vsyncpa [#allocation5], 1 }

</bundles_post_ra>
